<compile_context>
chip_gen: v6e
topology: v6e:2x2x1
jax: 0.10.0
libtpu: 0.0.40
codegen_flags: <defaults>
</compile_context>

<pallas_src>
import functools
import math

import jax
import jax.numpy as jnp
from jax.experimental import pallas as pl
from jax.experimental.pallas import tpu as pltpu


def _bce_sum_kernel(p_ref, t_ref, o_ref, acc_ref, *, tiles_per_split,
                    tile_rows, n_rows, needs_mask):
    j = pl.program_id(1)  # reduction axis (row tiles within this split)

    # Compute in float32 regardless of input dtype (mirrors autocast disabled).
    p = p_ref[...].astype(jnp.float32)
    t = t_ref[...].astype(jnp.float32)

    log_p = jnp.maximum(jnp.log(p), -100.0)
    log_1mp = jnp.maximum(jnp.log(1.0 - p), -100.0)
    # FMA-friendly: t*log_p + (1-t)*log_1mp == log_1mp + t*(log_p - log_1mp).
    # Accumulate the *positive* sum; the single negation happens in the wrapper.
    pos = log_1mp + t * (log_p - log_1mp)

    if needs_mask:  # static: only emitted for ragged / overflow grids
        i = pl.program_id(0)
        tile_idx = i * tiles_per_split + j
        row = jax.lax.broadcasted_iota(jnp.int32, pos.shape, 0) + tile_idx * tile_rows
        pos = jnp.where(row < n_rows, pos, 0.0)

    # Fold 8-row groups with pure VALU adds into the small (8, C) accumulator.
    part = pos.reshape(tile_rows // 8, 8, pos.shape[-1]).sum(axis=0)

    @pl.when(j == 0)
    def _():
        acc_ref[...] = part  # first tile: write directly, no zero pass

    @pl.when(j != 0)
    def _():
        acc_ref[...] += part

    @pl.when(j == tiles_per_split - 1)
    def _():
        # Single cross-lane/sublane reduce per split, outside the hot loop.
        o_ref[...] = jnp.sum(acc_ref[...], keepdims=True)


def _round_up(x, m):
    return (x + m - 1) // m * m


def _hw_defaults():
    """(num_parallel, target_tile_bytes, vmem_limit_bytes) per TPU generation."""
    kind = ""
    try:
        kind = jax.devices()[0].device_kind.lower()
    except Exception:
        pass
    if "v7" in kind:   # 2 TCs, 64 MiB VMEM per TC
        return 2, 3 * 1024 * 1024, 48 * 1024 * 1024
    if "v6" in kind:   # 1 TC, 128 MiB VMEM
        return 1, 4 * 1024 * 1024, 64 * 1024 * 1024
    if "v5" in kind:   # 1 TC, 128 MiB VMEM
        return 1, 4 * 1024 * 1024, 64 * 1024 * 1024
    return 1, 2 * 1024 * 1024, 32 * 1024 * 1024


def duq_loss(prediction, target, *, tile_rows=None, num_parallel=None,
             target_tile_bytes=None, vmem_limit_bytes=None):
    """DUQ loss = BCELoss(mean) in float32, computed with a Pallas TPU kernel."""
    assert prediction.shape == target.shape
    total = int(math.prod(prediction.shape))
    assert total > 0

    hw_np, hw_tile_bytes, hw_vmem = _hw_defaults()
    if num_parallel is None:
        num_parallel = hw_np
    if target_tile_bytes is None:
        target_tile_bytes = hw_tile_bytes
    if vmem_limit_bytes is None:
        vmem_limit_bytes = hw_vmem

    # Lane-dense working layout. A row-major reshape of a contiguous array is a
    # free metadata change, and the mean-reduction is order-insensitive.
    if total % 128 == 0:
        work_shape = (total // 128, 128)
    elif prediction.ndim >= 2:
        # TODO(synk): lane utilization is C/128 when the class dim isn't 128-aligned.
        work_shape = (total // prediction.shape[-1], prediction.shape[-1])
    else:
        work_shape = (1, total)
    p2 = jnp.reshape(prediction, work_shape)
    t2 = jnp.reshape(target, work_shape)
    n_rows, c_work = work_shape

    itemsize = max(jnp.dtype(p2.dtype).itemsize, jnp.dtype(t2.dtype).itemsize)
    sublane = max(8, 32 // itemsize)  # 8 for f32, 16 for bf16, 32 for 8-bit

    if tile_rows is None:
        tile_rows = max(
            sublane,
            (target_tile_bytes // (itemsize * c_work)) // sublane * sublane)
    # Prefer tiles that do not exceed the array (partial last tile is masked);
    # for very small inputs fall back to a single sublane-aligned tile.
    if n_rows >= sublane:
        cap = (n_rows // sublane) * sublane
    else:
        cap = sublane
    tile_rows = int(_round_up(max(sublane, min(int(tile_rows), cap)), sublane))

    n_tiles = int(pl.cdiv(n_rows, tile_rows))
    num_parallel = int(max(1, min(num_parallel, n_tiles)))
    tiles_per_split = int(pl.cdiv(n_tiles, num_parallel))
    covered_tiles = num_parallel * tiles_per_split
    needs_mask = (n_rows % tile_rows != 0) or (covered_tiles != n_tiles)

    if covered_tiles == n_tiles:
        in_map = lambda i, j: (i * tiles_per_split + j, 0)
    else:
        # Overflow tiles of the last split re-read the last valid tile (clamped
        # block index) and are fully zeroed by the in-kernel row mask.
        last_tile = n_tiles - 1
        in_map = lambda i, j: (jnp.minimum(i * tiles_per_split + j, last_tile), 0)

    kernel = functools.partial(
        _bce_sum_kernel,
        tiles_per_split=tiles_per_split,
        tile_rows=tile_rows,
        n_rows=n_rows,
        needs_mask=needs_mask,
    )

    partial_sums = pl.pallas_call(
        kernel,
        out_shape=jax.ShapeDtypeStruct((num_parallel, 1), jnp.float32),
        grid_spec=pltpu.PrefetchScalarGridSpec(
            num_scalar_prefetch=0,
            grid=(num_parallel, tiles_per_split),
            in_specs=[
                pl.BlockSpec((tile_rows, c_work), in_map),
                pl.BlockSpec((tile_rows, c_work), in_map),
            ],
            out_specs=pl.BlockSpec((1, 1), lambda i, j: (i, 0)),
            scratch_shapes=[pltpu.VMEM((8, c_work), jnp.float32)],
        ),
        compiler_params=pltpu.CompilerParams(
            dimension_semantics=("parallel", "arbitrary"),
            vmem_limit_bytes=int(vmem_limit_bytes),
        ),
    )(p2, t2)

    return -jnp.sum(partial_sums) / jnp.float32(total)


def duq_loss_ref(prediction, target):
    p = prediction.astype(jnp.float32)
    t = target.astype(jnp.float32)
    log_p = jnp.maximum(jnp.log(p), -100.0)
    log_1mp = jnp.maximum(jnp.log(1.0 - p), -100.0)
    return jnp.mean(-(t * log_p + (1.0 - t) * log_1mp))


if __name__ == "__main__":
    key = jax.random.PRNGKey(0)
    ks = jax.random.split(key, 6)

    # Case 1: aligned (16, 128) — single exact tile, no masking path.
    p1 = jax.nn.sigmoid(jax.random.normal(ks[0], (16, 128), dtype=jnp.float32))
    t1 = jax.random.uniform(ks[1], (16, 128), dtype=jnp.float32)
    l1 = jax.block_until_ready(duq_loss(p1, t1))
    r1 = duq_loss_ref(p1, t1)
    assert jnp.allclose(l1, r1, rtol=1e-5, atol=1e-6), (l1, r1)

    # Case 2: ragged rows (20, 128) — exercises the in-kernel row mask.
    p2 = jax.nn.sigmoid(jax.random.normal(ks[2], (20, 128), dtype=jnp.float32))
    t2 = jax.random.uniform(ks[3], (20, 128), dtype=jnp.float32)
    l2 = jax.block_until_ready(duq_loss(p2, t2))
    r2 = duq_loss_ref(p2, t2)
    assert jnp.allclose(l2, r2, rtol=1e-5, atol=1e-6), (l2, r2)

    # Case 3: class dim not 128 (16, 64) — exercises the free lane-dense reshape.
    p3 = jax.nn.sigmoid(jax.random.normal(ks[4], (16, 64), dtype=jnp.float32))
    t3 = jax.random.uniform(ks[5], (16, 64), dtype=jnp.float32)
    l3 = jax.block_until_ready(duq_loss(p3, t3))
    r3 = duq_loss_ref(p3, t3)
    assert jnp.allclose(l3, r3, rtol=1e-5, atol=1e-6), (l3, r3)

    print("KERNEL_OK")
</pallas_src>

<mosaic_0001>
module attributes {stable_mosaic.version = 11 : i64} {
  func.func @_bce_sum_kernel(%arg0: i32, %arg1: i32, %arg2: memref<16x128xf32, #tpu.memory_space<vmem>>, %arg3: memref<16x128xf32, #tpu.memory_space<vmem>>, %arg4: memref<1x1xf32, #tpu.memory_space<vmem>>, %arg5: memref<8x128xf32, #tpu.memory_space<vmem>>) attributes {dimension_semantics = [#tpu.dimension_semantics<parallel>, #tpu.dimension_semantics<arbitrary>], iteration_bounds = array<i64: 1, 1>, scalar_prefetch = 0 : i64, scratch_operands = 1 : i64, tpu.core_type = #tpu.core_type<tc>, window_params = [{transform_indices = @transform_0, window_bounds = array<i64: 16, 128>}, {transform_indices = @transform_1, window_bounds = array<i64: 16, 128>}, {transform_indices = @transform_2, window_bounds = array<i64: 1, 1>}]} {
    %c0 = arith.constant 0 : index
    %c0_0 = arith.constant 0 : index
    %0 = vector.load %arg2[%c0, %c0_0] : memref<16x128xf32, #tpu.memory_space<vmem>>, vector<16x128xf32>
    %c0_1 = arith.constant 0 : index
    %c0_2 = arith.constant 0 : index
    %1 = vector.load %arg3[%c0_1, %c0_2] : memref<16x128xf32, #tpu.memory_space<vmem>>, vector<16x128xf32>
    %2 = math.log %0 : vector<16x128xf32>
    %cst = arith.constant -1.000000e+02 : f32
    %3 = vector.broadcast %cst : f32 to vector<16x128xf32>
    %4 = arith.maximumf %2, %3 : vector<16x128xf32>
    %cst_3 = arith.constant 1.000000e+00 : f32
    %5 = vector.broadcast %cst_3 : f32 to vector<16x128xf32>
    %6 = arith.subf %5, %0 : vector<16x128xf32>
    %7 = math.log %6 : vector<16x128xf32>
    %cst_4 = arith.constant -1.000000e+02 : f32
    %8 = vector.broadcast %cst_4 : f32 to vector<16x128xf32>
    %9 = arith.maximumf %7, %8 : vector<16x128xf32>
    %10 = arith.subf %4, %9 : vector<16x128xf32>
    %11 = arith.mulf %1, %10 : vector<16x128xf32>
    %12 = arith.addf %9, %11 : vector<16x128xf32>
    %13 = vector.shape_cast %12 : vector<16x128xf32> to vector<2x8x128xf32>
    %cst_5 = arith.constant dense<0.000000e+00> : vector<8x128xf32>
    %14 = vector.multi_reduction <add>, %13, %cst_5 [0] : vector<2x8x128xf32> to vector<8x128xf32>
    %c0_i32 = arith.constant 0 : i32
    %15 = arith.cmpi eq, %arg1, %c0_i32 : i32
    %16 = arith.extui %15 : i1 to i32
    %c0_i32_6 = arith.constant 0 : i32
    %17 = arith.cmpi ne, %16, %c0_i32_6 : i32
    scf.if %17 {
      %c0_11 = arith.constant 0 : index
      %c0_12 = arith.constant 0 : index
      %24 = vector.load %arg5[%c0_11, %c0_12] : memref<8x128xf32, #tpu.memory_space<vmem>>, vector<8x128xf32>
      tpu.vector_store %arg5[%c0_11, %c0_12], %14 {strides = array<i32>} : memref<8x128xf32, #tpu.memory_space<vmem>>, vector<8x128xf32>,
    } else {
    }
    %c0_i32_7 = arith.constant 0 : i32
    %18 = arith.cmpi ne, %arg1, %c0_i32_7 : i32
    %19 = arith.extui %18 : i1 to i32
    %c0_i32_8 = arith.constant 0 : i32
    %20 = arith.cmpi ne, %19, %c0_i32_8 : i32
    scf.if %20 {
      %c0_11 = arith.constant 0 : index
      %c0_12 = arith.constant 0 : index
      %24 = vector.load %arg5[%c0_11, %c0_12] : memref<8x128xf32, #tpu.memory_space<vmem>>, vector<8x128xf32>
      %25 = arith.addf %24, %14 : vector<8x128xf32>
      %c0_13 = arith.constant 0 : index
      %c0_14 = arith.constant 0 : index
      %26 = vector.load %arg5[%c0_13, %c0_14] : memref<8x128xf32, #tpu.memory_space<vmem>>, vector<8x128xf32>
      tpu.vector_store %arg5[%c0_13, %c0_14], %25 {strides = array<i32>} : memref<8x128xf32, #tpu.memory_space<vmem>>, vector<8x128xf32>,
    } else {
    }
    %c0_i32_9 = arith.constant 0 : i32
    %21 = arith.cmpi eq, %arg1, %c0_i32_9 : i32
    %22 = arith.extui %21 : i1 to i32
    %c0_i32_10 = arith.constant 0 : i32
    %23 = arith.cmpi ne, %22, %c0_i32_10 : i32
    scf.if %23 {
      %c0_11 = arith.constant 0 : index
      %c0_12 = arith.constant 0 : index
      %24 = vector.load %arg5[%c0_11, %c0_12] : memref<8x128xf32, #tpu.memory_space<vmem>>, vector<8x128xf32>
      %25 = vector.shape_cast %24 : vector<8x128xf32> to vector<1x8x128xf32>
      %cst_13 = arith.constant dense<0.000000e+00> : vector<1xf32>
      %26 = vector.multi_reduction <add>, %25, %cst_13 [1, 2] : vector<1x8x128xf32> to vector<1xf32>
      %27 = vector.shape_cast %26 : vector<1xf32> to vector<1x1x1xf32>
      %28 = vector.extract %27[0, 0, 0] : f32 from vector<1x1x1xf32>
      %29 = vector.broadcast %28 : f32 to vector<1x1xf32>
      %c0_14 = arith.constant 0 : index
      %c0_15 = arith.constant 0 : index
      %30 = vector.load %arg4[%c0_14, %c0_15] : memref<1x1xf32, #tpu.memory_space<vmem>>, vector<1x1xf32>
      tpu.vector_store %arg4[%c0_14, %c0_15], %29 {strides = array<i32>} : memref<1x1xf32, #tpu.memory_space<vmem>>, vector<1x1xf32>,
    } else {
    }
    return
  }
  func.func @transform_0(%arg0: i32, %arg1: i32) -> (i32, i32) {
    %c1_i32 = arith.constant 1 : i32
    %0 = arith.muli %arg0, %c1_i32 : i32
    %1 = arith.addi %0, %arg1 : i32
    %c0_i32 = arith.constant 0 : i32
    %c0_i32_0 = arith.constant 0 : i32
    return %1, %c0_i32 : i32, i32
  }
  func.func @transform_1(%arg0: i32, %arg1: i32) -> (i32, i32) {
    %c1_i32 = arith.constant 1 : i32
    %0 = arith.muli %arg0, %c1_i32 : i32
    %1 = arith.addi %0, %arg1 : i32
    %c0_i32 = arith.constant 0 : i32
    %c0_i32_0 = arith.constant 0 : i32
    return %1, %c0_i32 : i32, i32
  }
  func.func @transform_2(%arg0: i32, %arg1: i32) -> (i32, i32) {
    %c0_i32 = arith.constant 0 : i32
    %c0_i32_0 = arith.constant 0 : i32
    return %arg0, %c0_i32 : i32, i32
  }
}

</mosaic_0001>

<bundles_post_ra>
// kernel: tpu_custom_call.1
= control target key start
LH: loop header
LB: loop body
LE: loop exit
PB: predicated region body
PF: predicated region fallthrough
CT: control target
= control target key end

     0   :  { %7 = vsyncpa [#allocation4], 0  ;;  %s231_s0 = inlined_call_operand.hbm [shape: f32[16,128], index: 0, kind: input, shape index: {}]   ;;  %s232_s1 = inlined_call_operand.hbm [shape: f32[16,128], index: 1, kind: input, shape index: {}]   ;;  %s233_s2 = inlined_call_operand.hbm [shape: f32[1,1], index: 2, kind: output, shape index: {}]  }
   0x1   :  { %8 = vsyncpa [#allocation7], 0 }
   0x2   :  { %9 = vsyncpa [#allocation5], 0  ;;  %s202_s9 = smov [#allocation3]  }
   0x3   :  { %s19_s10 = sshll.u32 %s202_s9, 4  ;;  %s20_s10 = int_to_ptr.vmem [resolvable:$true] %s19_s10 }
   0x4   :  { %s144_s11 = scalar_lea.vmem %s20_s10, 256  ;;  %p149_p1 = scmp.lt.s32.totalorder %s20_s10, %s20_s10 }
   0x5   :  { %p145_p0 = scmp.ne.s32.totalorder %s20_s10, %s144_s11  ;;  %p150_p2 = scmp.lt.s32.totalorder %s144_s11, %s144_s11 }
   0x7   :  { %p151_p3 = por %p150_p2, %p149_p1 }
   0x9   :  { %p152_p4 = pnand %p151_p3, %p145_p0 }
   0xb   :  { %155 = shalt.err (!%p152_p4)
}
   0xc   :  { %s203_s12 = smov 128   ;;  %s204_s13 = smov 8  }
   0xd   :  { %25 = dma.hbm_to_vmem [thread:$0]  %s231_s0, 256, %s20_s10, [#allocation4], %s203_s12, %s203_s12, %s204_s13  }
   0xe   :  { %s205_s16 = smov [#allocation6]  }
   0xf   :  { %s35_s17 = sshll.u32 %s205_s16, 4  ;;  %s36_s17 = int_to_ptr.vmem [resolvable:$true] %s35_s17 }
  0x10   :  { %s164_s18 = scalar_lea.vmem %s36_s17, 256  ;;  %p169_p6 = scmp.lt.s32.totalorder %s36_s17, %s36_s17 }
  0x11   :  { %p165_p5 = scmp.ne.s32.totalorder %s36_s17, %s164_s18  ;;  %p170_p7 = scmp.lt.s32.totalorder %s164_s18, %s164_s18 }
  0x13   :  { %p171_p8 = por %p170_p7, %p169_p6 }
  0x15   :  { %p172_p9 = pnand %p171_p8, %p165_p5 }
  0x17   :  { %175 = shalt.err (!%p172_p9)
}
  0x18   :  { %41 = dma.hbm_to_vmem [thread:$0]  %s232_s1, 256, %s36_s17, [#allocation7], %s203_s12, %s203_s12, %s204_s13  }
  0x19   :  { %196 = dma.done.wait [#allocation4], 256  }
  0x1a   :  { %197 = vsyncadd [#allocation4], 4294967040 }
  0x1b   :  { %198 = dma.done.wait [#allocation7], 256  }
  0x1c   :  { %199 = vsyncadd [#allocation7], 4294967040  ;;  %v52_v0 = vld [vmem:[#allocation3] sm:$0xff]  ;;  %v53_v1 = vld [vmem:[#allocation3 + $0x8] sm:$0xff]  ;;  %s206_s0 = smov [#allocation8]   ;;  %vm103_vm0 = vcmask 0  }
  0x1d   :  { %128 = vlog2.f32 %v52_v0  ;;  %v62_v2 = vsub.f32 1.0, %v52_v0  ;;  %v63_v3 = vsub.f32 1.0, %v53_v1  ;;  %v54_v15 = vld [vmem:[#allocation6] sm:$0xff]  ;;  %v55_v17 = vld [vmem:[#allocation6 + $0x8] sm:$0xff]  ;;  %s111_s1 = sshll.u32 %s206_s0, 4  ;;  %s112_s1 = int_to_ptr.vmem [resolvable:$true] %s111_s1 }
  0x1e   :  { %130 = vlog2.f32 %v53_v1  ;;  %s176_s22 = scalar_lea.vmem %s112_s1, 16  ;;  %s180_s23 = scalar_lea.vmem %s112_s1, 32 }
  0x1f   :  { %132 = vlog2.f32 %v62_v2  ;;  %p177_p10 = scmp.ne.s32.totalorder %s112_s1, %s176_s22  ;;  %p181_p11 = scmp.lt.s32.totalorder %s112_s1, %s112_s1 }
  0x20   :  { %134 = vlog2.f32 %v63_v3  ;;  %p182_p12 = scmp.lt.s32.totalorder %s180_s23, %s176_s22 }
  0x22   :  { %p183_p13 = por %p182_p12, %p181_p11 }
  0x24   :  { %p184_p0 = pnand %p183_p13, %p177_p10 }
  0x2a   :  { %v129_v4 = vpop.eup %128 }
  0x2b   :  { %v131_v5 = vpop.eup %130  ;;  %v57_v6 = vmul.f32 0.6931472, %v129_v4 }
  0x2c   :  { %v133_v7 = vpop.eup %132  ;;  %v59_v8 = vmul.f32 0.6931472, %v131_v5 }
  0x2d   :  { %v135_v9 = vpop.eup %134  ;;  %v60_v10 = vmax.f32 %v57_v6, -100.0  ;;  %v65_v11 = vmul.f32 0.6931472, %v133_v7 }
  0x2e   :  { %v61_v12 = vmax.f32 %v59_v8, -100.0  ;;  %v67_v13 = vmul.f32 0.6931472, %v135_v9 }
  0x2f   :  { %v68_v14 = vmax.f32 %v65_v11, -100.0 }
  0x30   :  { %v69_v16 = vmax.f32 %v67_v13, -100.0 }
  0x31   :  { %v70_v18 = vsub.f32 %v60_v10, %v68_v14 }
  0x32   :  { %v71_v19 = vsub.f32 %v61_v12, %v69_v16 }
  0x33   :  { %v72_v20 = vmul.f32 %v70_v18, %v54_v15 }
  0x34   :  { %v73_v21 = vmul.f32 %v71_v19, %v55_v17 }
  0x35   :  { %v74_v22 = vadd.f32 %v72_v20, %v68_v14 }
  0x36   :  { %v75_v23 = vadd.f32 %v73_v21, %v69_v16 }
  0x38   :  { %v76_v24 = vadd.f32 %v75_v23, %v74_v22 }
  0x3a   :  { %93 = vadd.xlane.f32.xlu0 %v76_v24 }
  0xc3   :  { %v94_v25 = vpop.xlane.xlu0 %93 }
  0xc4   :  { %v95_v26 = vrot.slane %v94_v25, 4 }
  0xc6   :  { %v96_v27 = vadd.f32 %v95_v26, %v94_v25 }
  0xc8   :  { %v97_v28 = vrot.slane %v96_v27, 2 }
  0xca   :  { %v98_v29 = vadd.f32 %v97_v28, %v96_v27 }
  0xcc   :  { %v99_v30 = vrot.slane %v98_v29, 1 }
  0xce   :  { %v100_v31 = vadd.f32 %v99_v30, %v98_v29 }
  0xd0   :  { %121 = vpush %v100_v31 }
 0x101   :  { %s122_s21 = spop %121 }
 0x102   :  { %v102_v32 = vstv %s122_s21 }
 0x103   :  { %104 = vst.msk [vmem:[#allocation8] sm:$0x1] %vm103_vm0, %v102_v32 }
 0x104   :  { %187 = shalt.err (!%p184_p0)
}
 0x105   :  { %114 = dma.vmem_to_hbm [thread:$0]  %s112_s1, 16, %s233_s2, [#allocation5]  }
 0x106   :  { %200 = dma.done.wait [#allocation5], 16  }
 0x107   :  { %201 = vsyncadd [#allocation5], 4294967280 }
 0x108   :  { %118 = vsyncpa [#allocation4], 1 }
 0x109   :  { %119 = vsyncpa [#allocation7], 1 }
 0x10a   :  { %120 = vsyncpa [#allocation5], 1 }

</bundles_post_ra>
